<compile_context>
chip_gen: v5e
topology: v5e:2x2
jax: 0.10.0
libtpu: 0.0.40
codegen_flags: <defaults>
</compile_context>

<pallas_src>
import functools

import jax
import jax.numpy as jnp
from jax.experimental import pallas as pl
from jax.experimental.pallas import tpu as pltpu

BN_EPS = 1e-5
LANE = 128
OUT_DTYPE = jnp.float32            # bf16 halves pass-2 store bytes if acceptable downstream
FUSED_VMEM_BUDGET = 16 << 20       # conservative: fused path fits even v7x's 64 MiB VMEM


def _round_up(x, m):
    return (x + m - 1) // m * m


def _vmem_limit_bytes():
    """Per-generation scoped-VMEM budget: headroom under v7x's 64 MiB physical VMEM,
    while letting v5e/v6e (128 MiB) exceed the 32 MiB scoped default."""
    try:
        cap = pltpu.get_tpu_info().vmem_capacity_bytes
    except Exception:
        cap = 64 << 20
    return min(int(cap) * 3 // 4, 96 << 20)


# --------------------------------------------------------------------------- kernels

def _fused_kernel(x_ref, w_ref, gb_ref, o_ref, *, count):
    """Single pass: conv GEMM + training-mode BN stats + folded scale/shift + ReLU.

    x_ref:  (R, KPAD) bf16 im2col patches (zero-padded rows/K)
    w_ref:  (KPAD, Cpad) bf16
    gb_ref: (2, Cpad) f32  [gamma; beta]
    """
    z = jnp.dot(x_ref[...], w_ref[...], preferred_element_type=jnp.float32)
    inv_n = 1.0 / count                                   # zero-padded rows add 0 to the sums
    mean = jnp.sum(z, axis=0, keepdims=True) * inv_n
    var = jnp.maximum(jnp.sum(z * z, axis=0, keepdims=True) * inv_n - mean * mean, 0.0)
    scale = gb_ref[0:1, :] * jax.lax.rsqrt(var + BN_EPS)  # gamma / sqrt(var+eps)  (EUP)
    shift = gb_ref[1:2, :] - mean * scale                 # conv bias cancels exactly
    o_ref[...] = jnp.maximum(z * scale + shift, 0.0).astype(o_ref.dtype)


def _stats_kernel(x_ref, w_ref, acc_ref):
    """Two-pass fallback, pass 1: per-channel sum / sum-of-squares of the conv output.

    acc_ref: (8, Cpad) resident accumulator per core-parallel split (rows 0/1 used,
    8-row padding keeps the block (8,128)-tileable)."""
    @pl.when(pl.program_id(1) == 0)
    def _():
        acc_ref[...] = jnp.zeros_like(acc_ref)

    z = jnp.dot(x_ref[...], w_ref[...], preferred_element_type=jnp.float32)
    s1 = jnp.sum(z, axis=0, keepdims=True)
    s2 = jnp.sum(z * z, axis=0, keepdims=True)
    pad = jnp.zeros((acc_ref.shape[0] - 2, acc_ref.shape[1]), jnp.float32)
    acc_ref[...] += jnp.concatenate([s1, s2, pad], axis=0)


def _apply_kernel(x_ref, w_ref, ss_ref, o_ref):
    """Two-pass fallback, pass 2: recompute conv GEMM, apply scale/shift + ReLU."""
    z = jnp.dot(x_ref[...], w_ref[...], preferred_element_type=jnp.float32)
    o_ref[...] = jnp.maximum(z * ss_ref[0:1, :] + ss_ref[1:2, :], 0.0).astype(o_ref.dtype)


# --------------------------------------------------------------------------- packing

def _im2col_stride2(x):
    """NCHW f32 -> ((N*Ho*Wo), 9*Cin) bf16 patches for a k=3, s=2, p=1 conv."""
    n, c, h, w = x.shape
    ho, wo = h // 2, w // 2
    xh = jnp.transpose(x, (0, 2, 3, 1))                          # NHWC
    xp = jnp.pad(xh, ((0, 0), (1, 1), (1, 1), (0, 0)))           # (N, H+2, W+2, C)
    patches = [xp[:, kh:kh + 2 * ho:2, kw:kw + 2 * wo:2, :]      # 9 x (N, ho, wo, C)
               for kh in range(3) for kw in range(3)]
    lhs = jnp.stack(patches, axis=3)                             # (N, ho, wo, 9, C)
    return lhs.reshape(n * ho * wo, 9 * c).astype(jnp.bfloat16), ho, wo


def _pack_weight(weight, kpad, cpad):
    """(O, I, 3, 3) -> (KPAD, Cpad) bf16 with (kh, kw, cin) contraction ordering."""
    o, i, _, _ = weight.shape
    w = jnp.transpose(weight, (2, 3, 1, 0)).reshape(9 * i, o)
    return jnp.pad(w, ((0, kpad - 9 * i), (0, cpad - o))).astype(jnp.bfloat16)


# --------------------------------------------------------------------------- forward

def _forward(x, t, weight, bias, gamma, beta, *, force_two_pass=False):
    """x: (N, s_C, s_H, s_W) NCHW; t passed through (s_H == 2*t_H branch)."""
    del bias  # cancels exactly under training-mode BatchNorm (y - mean(y))
    n, c, h, w = x.shape
    t_c = weight.shape[0]
    cpad = _round_up(max(t_c, LANE), LANE)
    kpad = _round_up(9 * c, LANE)               # lane-dense K for one fused-im2col GEMM

    lhs, ho, wo = _im2col_stride2(x)            # (total_rows, 9*C) bf16
    total_rows = n * ho * wo
    count = float(total_rows)
    w_packed = _pack_weight(weight, kpad, cpad)

    gamma_p = jnp.pad(gamma.astype(jnp.float32), (0, cpad - t_c), constant_values=1.0)
    beta_p = jnp.pad(beta.astype(jnp.float32), (0, cpad - t_c))
    vmem_limit = _vmem_limit_bytes()
    out_itemsize = jnp.dtype(OUT_DTYPE).itemsize

    rows8 = _round_up(total_rows, 8)
    fused_bytes = rows8 * (2 * kpad + 8 * cpad) + 2 * kpad * cpad + 8 * cpad

    if (not force_two_pass) and fused_bytes <= FUSED_VMEM_BUDGET:
        # ---- Fused single-pass path (small batches): one launch, no HBM round trips ----
        lhs_p = jnp.pad(lhs, ((0, rows8 - total_rows), (0, kpad - 9 * c)))
        gb = jnp.stack([gamma_p, beta_p], axis=0)
        out2d = pl.pallas_call(
            functools.partial(_fused_kernel, count=count),
            out_shape=jax.ShapeDtypeStruct((rows8, cpad), OUT_DTYPE),
            grid_spec=pltpu.PrefetchScalarGridSpec(
                num_scalar_prefetch=0,
                grid=(1,),
                in_specs=[pl.BlockSpec((rows8, kpad), lambda i: (0, 0)),
                          pl.BlockSpec((kpad, cpad), lambda i: (0, 0)),
                          pl.BlockSpec((2, cpad), lambda i: (0, 0))],
                out_specs=pl.BlockSpec((rows8, cpad), lambda i: (0, 0)),
            ),
            compiler_params=pltpu.CompilerParams(
                dimension_semantics=("arbitrary",),
                vmem_limit_bytes=vmem_limit),
            cost_estimate=pl.CostEstimate(
                flops=2 * rows8 * kpad * cpad + 8 * rows8 * cpad,
                transcendentals=cpad,
                bytes_accessed=rows8 * kpad * 2 + kpad * cpad * 2 + 8 * cpad
                               + rows8 * cpad * out_itemsize),
        )(lhs_p, w_packed, gb)
    else:
        # ---- Two-pass fallback (large batches): row-tiled grid ----
        row_tile = 512 if total_rows >= 512 else _round_up(total_rows, 8)
        num_tiles = -(-total_rows // row_tile)
        nsplit = 2 if num_tiles >= 2 else 1     # per-core partial stats (v7x: 2 TCs)
        num_tiles = _round_up(num_tiles, nsplit)
        tiles_per_split = num_tiles // nsplit
        rows_padded = num_tiles * row_tile

        lhs_p = jnp.pad(lhs, ((0, rows_padded - total_rows), (0, kpad - 9 * c)))
        gemm_flops = 2 * rows_padded * kpad * cpad
        lhs_bytes = rows_padded * kpad * 2
        w_bytes = kpad * cpad * 2

        # Pass 1: per-channel sum / sumsq, one resident (8, Cpad) accumulator per split.
        stats_raw = pl.pallas_call(
            _stats_kernel,
            out_shape=jax.ShapeDtypeStruct((nsplit * 8, cpad), jnp.float32),
            grid_spec=pltpu.PrefetchScalarGridSpec(
                num_scalar_prefetch=0,
                grid=(nsplit, tiles_per_split),
                in_specs=[pl.BlockSpec((row_tile, kpad),
                                       lambda s, tt: (s * tiles_per_split + tt, 0)),
                          pl.BlockSpec((kpad, cpad), lambda s, tt: (0, 0))],
                out_specs=pl.BlockSpec((8, cpad), lambda s, tt: (s, 0)),
            ),
            compiler_params=pltpu.CompilerParams(
                dimension_semantics=("parallel", "arbitrary"),
                vmem_limit_bytes=vmem_limit),
            cost_estimate=pl.CostEstimate(
                flops=gemm_flops + 3 * rows_padded * cpad,
                transcendentals=0,
                bytes_accessed=lhs_bytes + w_bytes + nsplit * 8 * cpad * 4),
        )(lhs_p, w_packed)

        # Tiny XLA glue: fold training-mode BN + affine into per-channel scale/shift.
        stats = stats_raw.reshape(nsplit, 8, cpad)[:, :2, :].sum(axis=0)
        mean = stats[0] / count
        var = jnp.maximum(stats[1] / count - mean * mean, 0.0)    # biased variance
        scale = gamma_p * jax.lax.rsqrt(var + BN_EPS)
        shift = beta_p - mean * scale
        ss = jnp.stack([scale, shift], axis=0)                    # (2, Cpad) f32

        # Pass 2: recompute the cheap conv GEMM, apply scale/shift + ReLU.
        out2d = pl.pallas_call(
            _apply_kernel,
            out_shape=jax.ShapeDtypeStruct((rows_padded, cpad), OUT_DTYPE),
            grid_spec=pltpu.PrefetchScalarGridSpec(
                num_scalar_prefetch=0,
                grid=(num_tiles,),
                in_specs=[pl.BlockSpec((row_tile, kpad), lambda i: (i, 0)),
                          pl.BlockSpec((kpad, cpad), lambda i: (0, 0)),
                          pl.BlockSpec((2, cpad), lambda i: (0, 0))],
                out_specs=pl.BlockSpec((row_tile, cpad), lambda i: (i, 0)),
            ),
            compiler_params=pltpu.CompilerParams(
                dimension_semantics=("parallel",),
                vmem_limit_bytes=vmem_limit),
            cost_estimate=pl.CostEstimate(
                flops=gemm_flops + 3 * rows_padded * cpad,
                transcendentals=0,
                bytes_accessed=lhs_bytes + w_bytes + 2 * cpad * 4
                               + rows_padded * cpad * out_itemsize),
        )(lhs_p, w_packed, ss)

    # Drop padded rows / channels, back to NCHW.
    out = out2d[:total_rows, :t_c].astype(jnp.float32)
    out = jnp.transpose(out.reshape(n, ho, wo, t_c), (0, 3, 1, 2))
    return out, t


convreg_forward = jax.jit(_forward)
convreg_forward_tiled = jax.jit(functools.partial(_forward, force_two_pass=True))


# --------------------------------------------------------------------------- reference

def _reference(x, t, weight, bias, gamma, beta, gemm_dtype=jnp.float32):
    y = jax.lax.conv_general_dilated(
        x.astype(gemm_dtype), weight.astype(gemm_dtype),
        window_strides=(2, 2), padding=((1, 1), (1, 1)),
        dimension_numbers=("NCHW", "OIHW", "NCHW"),
        preferred_element_type=jnp.float32)
    y = y + bias.reshape(1, -1, 1, 1)
    mean = jnp.mean(y, axis=(0, 2, 3), keepdims=True)
    var = jnp.mean((y - mean) ** 2, axis=(0, 2, 3), keepdims=True)
    y = (y - mean) * jax.lax.rsqrt(var + BN_EPS)
    y = y * gamma.reshape(1, -1, 1, 1) + beta.reshape(1, -1, 1, 1)
    return jnp.maximum(y, 0.0), t


if __name__ == "__main__":
    # s_H == 2 * t_H branch of ConvReg.
    N, s_C, s_H, s_W = 2, 4, 16, 16
    t_C, t_H, t_W = 8, 8, 8

    key = jax.random.PRNGKey(0)
    kx, kt, kw, kb, kg, ke = jax.random.split(key, 6)
    x = jax.random.normal(kx, (N, s_C, s_H, s_W), jnp.float32)
    t = jax.random.normal(kt, (N, t_C, t_H, t_W), jnp.float32)
    weight = jax.random.normal(kw, (t_C, s_C, 3, 3), jnp.float32) * 0.1
    bias = jax.random.normal(kb, (t_C,), jnp.float32) * 0.05
    gamma = 1.0 + 0.1 * jax.random.normal(kg, (t_C,), jnp.float32)
    beta = 0.05 * jax.random.normal(ke, (t_C,), jnp.float32)

    out, t_out = convreg_forward(x, t, weight, bias, gamma, beta)
    jax.block_until_ready((out, t_out))
    assert out.shape == (N, t_C, t_H, t_W)

    # Apples-to-apples: reference conv on the same bf16-cast operands (f32 accumulation).
    ref_bf, _ = _reference(x, t, weight, bias, gamma, beta, gemm_dtype=jnp.bfloat16)
    assert jnp.allclose(out, ref_bf, atol=2e-3, rtol=2e-3), "mismatch vs bf16 reference"

    # Full-f32 PyTorch semantics (loose tolerance only for the bf16 GEMM operands).
    ref_f32, _ = _reference(x, t, weight, bias, gamma, beta, gemm_dtype=jnp.float32)
    assert jnp.allclose(out, ref_f32, atol=1e-1, rtol=0.0), "mismatch vs f32 reference"

    # Also exercise the large-batch two-pass fallback path on the same inputs.
    out_tiled, _ = convreg_forward_tiled(x, t, weight, bias, gamma, beta)
    jax.block_until_ready(out_tiled)
    assert jnp.allclose(out_tiled, out, atol=2e-3, rtol=2e-3), "two-pass path mismatch"

    assert jnp.array_equal(t_out, t)
    print("KERNEL_OK")
</pallas_src>

<mosaic_0001>
module attributes {stable_mosaic.version = 11 : i64} {
  func.func @_fused_kernel(%arg0: i32, %arg1: memref<128x128xbf16, #tpu.memory_space<vmem>>, %arg2: memref<128x128xbf16, #tpu.memory_space<vmem>>, %arg3: memref<2x128xf32, #tpu.memory_space<vmem>>, %arg4: memref<128x128xf32, #tpu.memory_space<vmem>>) attributes {dimension_semantics = [#tpu.dimension_semantics<arbitrary>], iteration_bounds = array<i64: 1>, scalar_prefetch = 0 : i64, scratch_operands = 0 : i64, tpu.core_type = #tpu.core_type<tc>, window_params = [{pipeline_mode = #tpu.pipeline_mode<synchronous>, transform_indices = @transform_0, window_bounds = array<i64: 128, 128>}, {pipeline_mode = #tpu.pipeline_mode<synchronous>, transform_indices = @transform_1, window_bounds = array<i64: 128, 128>}, {pipeline_mode = #tpu.pipeline_mode<synchronous>, transform_indices = @transform_2, window_bounds = array<i64: 2, 128>}, {pipeline_mode = #tpu.pipeline_mode<synchronous>, transform_indices = @transform_3, window_bounds = array<i64: 128, 128>}]} {
    %c0 = arith.constant 0 : index
    %c0_0 = arith.constant 0 : index
    %0 = vector.load %arg1[%c0, %c0_0] : memref<128x128xbf16, #tpu.memory_space<vmem>>, vector<128x128xbf16>
    %c0_1 = arith.constant 0 : index
    %c0_2 = arith.constant 0 : index
    %1 = vector.load %arg2[%c0_1, %c0_2] : memref<128x128xbf16, #tpu.memory_space<vmem>>, vector<128x128xbf16>
    %cst = arith.constant dense<0.000000e+00> : vector<128x128xf32>
    %2 = tpu.matmul %0, %1, %cst {dimension_numbers = #tpu.dot_dimension_numbers<[1], [0], [0], [1], [0, 0, 1, 1], [], []>} : vector<128x128xbf16>, vector<128x128xbf16>, vector<128x128xf32> -> vector<128x128xf32>
    %cst_3 = arith.constant dense<0.000000e+00> : vector<128xf32>
    %3 = vector.multi_reduction <add>, %2, %cst_3 [0] : vector<128x128xf32> to vector<128xf32>
    %4 = vector.shape_cast %3 : vector<128xf32> to vector<1x128xf32>
    %cst_4 = arith.constant 7.812500e-03 : f32
    %5 = vector.broadcast %cst_4 : f32 to vector<1x128xf32>
    %6 = arith.mulf %4, %5 : vector<1x128xf32>
    %7 = arith.mulf %2, %2 : vector<128x128xf32>
    %cst_5 = arith.constant dense<0.000000e+00> : vector<128xf32>
    %8 = vector.multi_reduction <add>, %7, %cst_5 [0] : vector<128x128xf32> to vector<128xf32>
    %9 = vector.shape_cast %8 : vector<128xf32> to vector<1x128xf32>
    %cst_6 = arith.constant 7.812500e-03 : f32
    %10 = vector.broadcast %cst_6 : f32 to vector<1x128xf32>
    %11 = arith.mulf %9, %10 : vector<1x128xf32>
    %12 = arith.mulf %6, %6 : vector<1x128xf32>
    %13 = arith.subf %11, %12 : vector<1x128xf32>
    %cst_7 = arith.constant 0.000000e+00 : f32
    %14 = vector.broadcast %cst_7 : f32 to vector<1x128xf32>
    %15 = arith.maximumf %13, %14 : vector<1x128xf32>
    %c0_8 = arith.constant 0 : index
    %c0_9 = arith.constant 0 : index
    %16 = vector.load %arg3[%c0_8, %c0_9] : memref<2x128xf32, #tpu.memory_space<vmem>>, vector<1x128xf32>
    %cst_10 = arith.constant 9.99999974E-6 : f32
    %17 = vector.broadcast %cst_10 : f32 to vector<1x128xf32>
    %18 = arith.addf %15, %17 : vector<1x128xf32>
    %19 = math.rsqrt %18 : vector<1x128xf32>
    %20 = arith.mulf %16, %19 : vector<1x128xf32>
    %c1 = arith.constant 1 : index
    %c0_11 = arith.constant 0 : index
    %21 = vector.load %arg3[%c1, %c0_11] : memref<2x128xf32, #tpu.memory_space<vmem>>, vector<1x128xf32>
    %22 = arith.mulf %6, %20 : vector<1x128xf32>
    %23 = arith.subf %21, %22 : vector<1x128xf32>
    %24 = vector.broadcast %20 : vector<1x128xf32> to vector<128x128xf32>
    %25 = arith.mulf %2, %24 : vector<128x128xf32>
    %26 = vector.broadcast %23 : vector<1x128xf32> to vector<128x128xf32>
    %27 = arith.addf %25, %26 : vector<128x128xf32>
    %cst_12 = arith.constant 0.000000e+00 : f32
    %28 = vector.broadcast %cst_12 : f32 to vector<128x128xf32>
    %29 = arith.maximumf %27, %28 : vector<128x128xf32>
    %c0_13 = arith.constant 0 : index
    %c0_14 = arith.constant 0 : index
    %30 = vector.load %arg4[%c0_13, %c0_14] : memref<128x128xf32, #tpu.memory_space<vmem>>, vector<128x128xf32>
    tpu.vector_store %arg4[%c0_13, %c0_14], %29 {strides = array<i32>} : memref<128x128xf32, #tpu.memory_space<vmem>>, vector<128x128xf32>,
    return
  }
  func.func @transform_0(%arg0: i32) -> (i32, i32) {
    %c0_i32 = arith.constant 0 : i32
    %c0_i32_0 = arith.constant 0 : i32
    %c0_i32_1 = arith.constant 0 : i32
    return %c0_i32, %c0_i32_0 : i32, i32
  }
  func.func @transform_1(%arg0: i32) -> (i32, i32) {
    %c0_i32 = arith.constant 0 : i32
    %c0_i32_0 = arith.constant 0 : i32
    %c0_i32_1 = arith.constant 0 : i32
    return %c0_i32, %c0_i32_0 : i32, i32
  }
  func.func @transform_2(%arg0: i32) -> (i32, i32) {
    %c0_i32 = arith.constant 0 : i32
    %c0_i32_0 = arith.constant 0 : i32
    %c0_i32_1 = arith.constant 0 : i32
    return %c0_i32, %c0_i32_0 : i32, i32
  }
  func.func @transform_3(%arg0: i32) -> (i32, i32) {
    %c0_i32 = arith.constant 0 : i32
    %c0_i32_0 = arith.constant 0 : i32
    %c0_i32_1 = arith.constant 0 : i32
    return %c0_i32, %c0_i32_0 : i32, i32
  }
}

</mosaic_0001>

<bundles_post_ra>
// kernel: _forward.1
= control target key start
LH: loop header
LB: loop body
LE: loop exit
PB: predicated region body
PF: predicated region fallthrough
CT: control target
= control target key end

     0   :  { %s664_s1 = inlined_call_operand.vmem [shape: bf16[128,128], index: 1, kind: input, shape index: {}]   ;;  %s665_s0 = inlined_call_operand.vmem [shape: bf16[128,128], index: 0, kind: input, shape index: {}]   ;;  %s666_s2 = inlined_call_operand.vmem [shape: f32[2,128], index: 2, kind: input, shape index: {}]   ;;  %s667_s3 = inlined_call_operand.vmem [shape: f32[128,128], index: 3, kind: output, shape index: {}]  }
   0x1   :  { %v419_v0 = vld [vmem:[%s664_s1 + $0x38] sm:$0xff]  ;;  %v418_v1 = vld [vmem:[%s664_s1 + $0x30] sm:$0xff]  ;;  %v417_v2 = vld [vmem:[%s664_s1 + $0x28] sm:$0xff] }
   0x2   :  { %142 = vmatpush.bf16.msra.mxu0 %v419_v0  ;;  %420 = vmatpush.bf16.msra.mxu1 %v419_v0  ;;  %v416_v3 = vld [vmem:[%s664_s1 + $0x20] sm:$0xff]  ;;  %v415_v4 = vld [vmem:[%s664_s1 + $0x18] sm:$0xff]  ;;  %v414_v5 = vld [vmem:[%s664_s1 + $0x10] sm:$0xff] }
   0x3   :  { %421 = vmatpush.bf16.msra.mxu2 %v419_v0  ;;  %422 = vmatpush.bf16.msra.mxu3 %v419_v0  ;;  %v413_v6 = vld [vmem:[%s664_s1 + $0x8] sm:$0xff]  ;;  %v412_v7 = vld [vmem:[%s664_s1] sm:$0xff]  ;;  %v406_v9 = vld [vmem:[%s665_s0 + $0x10] sm:$0xff] }
   0x4   :  { %v404_v8 = vld [vmem:[%s665_s0] sm:$0xff]  ;;  %v410_v11 = vld [vmem:[%s665_s0 + $0x30] sm:$0xff]  ;;  %v405_v12 = vld [vmem:[%s665_s0 + $0x8] sm:$0xff] }
   0x5   :  { %v408_v10 = vld [vmem:[%s665_s0 + $0x20] sm:$0xff]  ;;  %v407_v13 = vld [vmem:[%s665_s0 + $0x18] sm:$0xff]  ;;  %v409_v14 = vld [vmem:[%s665_s0 + $0x28] sm:$0xff] }
   0x6   :  { %143 = vmatpush.bf16.msra.mxu0 %v418_v1  ;;  %423 = vmatpush.bf16.msra.mxu1 %v418_v1  ;;  %v411_v15 = vld [vmem:[%s665_s0 + $0x38] sm:$0xff] }
   0x7   :  { %424 = vmatpush.bf16.msra.mxu2 %v418_v1  ;;  %425 = vmatpush.bf16.msra.mxu3 %v418_v1 }
   0xa   :  { %144 = vmatpush.bf16.msra.mxu0 %v417_v2  ;;  %426 = vmatpush.bf16.msra.mxu1 %v417_v2 }
   0xb   :  { %427 = vmatpush.bf16.msra.mxu2 %v417_v2  ;;  %428 = vmatpush.bf16.msra.mxu3 %v417_v2 }
   0xe   :  { %145 = vmatpush.bf16.msra.mxu0 %v416_v3  ;;  %429 = vmatpush.bf16.msra.mxu1 %v416_v3 }
   0xf   :  { %430 = vmatpush.bf16.msra.mxu2 %v416_v3  ;;  %431 = vmatpush.bf16.msra.mxu3 %v416_v3 }
  0x12   :  { %146 = vmatpush.bf16.msra.mxu0 %v415_v4  ;;  %432 = vmatpush.bf16.msra.mxu1 %v415_v4 }
  0x13   :  { %433 = vmatpush.bf16.msra.mxu2 %v415_v4  ;;  %434 = vmatpush.bf16.msra.mxu3 %v415_v4 }
  0x16   :  { %147 = vmatpush.bf16.msra.mxu0 %v414_v5  ;;  %435 = vmatpush.bf16.msra.mxu1 %v414_v5 }
  0x17   :  { %436 = vmatpush.bf16.msra.mxu2 %v414_v5  ;;  %437 = vmatpush.bf16.msra.mxu3 %v414_v5 }
  0x1a   :  { %148 = vmatpush.bf16.msra.mxu0 %v413_v6  ;;  %438 = vmatpush.bf16.msra.mxu1 %v413_v6 }
  0x1b   :  { %439 = vmatpush.bf16.msra.mxu2 %v413_v6  ;;  %440 = vmatpush.bf16.msra.mxu3 %v413_v6 }
  0x1e   :  { %149 = vmatpush.bf16.msra.mxu0 %v412_v7  ;;  %441 = vmatpush.bf16.msra.mxu1 %v412_v7 }
  0x1f   :  { %442 = vmatpush.bf16.msra.mxu2 %v412_v7  ;;  %443 = vmatpush.bf16.msra.mxu3 %v412_v7 }
  0x21   :  { %150 = vmatmul.bf16.vlgmr.msra.gmra.mxu0 %v404_v8  ;;  %160 = vmatmul.bf16.vlgmr.msra.gmra.mxu1 %v406_v9 }
  0x22   :  { %170 = vmatmul.bf16.vlgmr.msra.gmra.mxu2 %v408_v10  ;;  %180 = vmatmul.bf16.vlgmr.msra.gmra.mxu3 %v410_v11 }
  0x31   :  { %155 = vmatmul.bf16.gmra.mxu0 %v405_v12  ;;  %165 = vmatmul.bf16.gmra.mxu1 %v407_v13 }
  0x32   :  { %175 = vmatmul.bf16.gmra.mxu2 %v409_v14  ;;  %185 = vmatmul.bf16.gmra.mxu3 %v411_v15 }
  0x9e   :  { %v514_v16 = vpop.f32.mrf.mxu0  ;;  %v516_v17 = vpop.f32.mrf.mxu1 }
  0x9f   :  { %v213_v26 = vmul.f32 %v514_v16, %v514_v16  ;;  %v217_v36 = vmul.f32 %v516_v17, %v516_v17 }
  0xa5   :  { %v520_v19 = vpop.f32.mrf.mxu2  ;;  %v526_v22 = vpop.f32.mrf.mxu3 }
  0xa6   :  { %v518_v18 = vpop.f32.mrf.mxu0  ;;  %v522_v20 = vpop.f32.mrf.mxu1  ;;  %v221_v50 = vmul.f32 %v520_v19, %v520_v19  ;;  %v225_v0 = vmul.f32 %v526_v22, %v526_v22 }
  0xa7   :  { %v214_v24 = vmul.f32 %v518_v18, %v518_v18  ;;  %v191_v27 = vadd.f32 %v518_v18, %v514_v16  ;;  %v218_v40 = vmul.f32 %v522_v20, %v522_v20 }
  0xa9   :  { %v229_v29 = vadd.f32 %v214_v24, %v213_v26 }
  0xad   :  { %v528_v23 = vpop.f32.mrf.mxu2  ;;  %v546_v35 = vpop.f32.mrf.mxu3 }
  0xae   :  { %v524_v21 = vpop.f32.mrf.mxu0  ;;  %v532_v25 = vpop.f32.mrf.mxu1  ;;  %v222_v54 = vmul.f32 %v528_v23, %v528_v23  ;;  %v226_v3 = vmul.f32 %v546_v35, %v546_v35 }
  0xaf   :  { %v215_v28 = vmul.f32 %v524_v21, %v524_v21  ;;  %v192_v30 = vadd.f32 %v191_v27, %v524_v21  ;;  %v219_v44 = vmul.f32 %v532_v25, %v532_v25 }
  0xb1   :  { %v230_v32 = vadd.f32 %v229_v29, %v215_v28 }
  0xb5   :  { %v551_v39 = vpop.f32.mrf.mxu2  ;;  %v567_v53 = vpop.f32.mrf.mxu3 }
  0xb6   :  { %v541_v31 = vpop.f32.mrf.mxu0  ;;  %v556_v43 = vpop.f32.mrf.mxu1  ;;  %v223_v59 = vmul.f32 %v551_v39, %v551_v39  ;;  %v227_v8 = vmul.f32 %v567_v53, %v567_v53 }
  0xb7   :  { %v193_v33 = vadd.f32 %v192_v30, %v541_v31  ;;  %v216_v34 = vmul.f32 %v541_v31, %v541_v31  ;;  %v220_v48 = vmul.f32 %v556_v43, %v556_v43 }
  0xb9   :  { %v194_v37 = vadd.f32 %v193_v33, %v516_v17  ;;  %v231_v38 = vadd.f32 %v230_v32, %v216_v34 }
  0xbb   :  { %v232_v41 = vadd.f32 %v231_v38, %v217_v36  ;;  %v195_v42 = vadd.f32 %v194_v37, %v522_v20 }
  0xbd   :  { %v196_v45 = vadd.f32 %v195_v42, %v532_v25  ;;  %v233_v46 = vadd.f32 %v232_v41, %v218_v40  ;;  %v572_v57 = vpop.f32.mrf.mxu2  ;;  %v586_v6 = vpop.f32.mrf.mxu3 }
  0xbe   :  { %v224_v63 = vmul.f32 %v572_v57, %v572_v57  ;;  %v228_v12 = vmul.f32 %v586_v6, %v586_v6 }
  0xbf   :  { %v197_v47 = vadd.f32 %v196_v45, %v556_v43  ;;  %v234_v49 = vadd.f32 %v233_v46, %v219_v44 }
  0xc1   :  { %v198_v51 = vadd.f32 %v197_v47, %v520_v19  ;;  %v235_v52 = vadd.f32 %v234_v49, %v220_v48 }
  0xc3   :  { %v236_v55 = vadd.f32 %v235_v52, %v221_v50  ;;  %v199_v56 = vadd.f32 %v198_v51, %v528_v23  ;;  %v254_v50 = vld [vmem:[%s666_s2] sm:$0x1] }
  0xc5   :  { %v200_v58 = vadd.f32 %v199_v56, %v551_v39  ;;  %v237_v60 = vadd.f32 %v236_v55, %v222_v54  ;;  %v267_v55 = vld [vmem:[%s666_s2 + $0x1] sm:$0x1] }
  0xc7   :  { %v238_v61 = vadd.f32 %v237_v60, %v223_v59  ;;  %v201_v62 = vadd.f32 %v200_v58, %v572_v57 }
  0xc9   :  { %v202_v1 = vadd.f32 %v201_v62, %v526_v22  ;;  %v239_v2 = vadd.f32 %v238_v61, %v224_v63 }
  0xcb   :  { %v240_v4 = vadd.f32 %v239_v2, %v225_v0  ;;  %v203_v5 = vadd.f32 %v202_v1, %v546_v35 }
  0xcd   :  { %v204_v7 = vadd.f32 %v203_v5, %v567_v53  ;;  %v241_v9 = vadd.f32 %v240_v4, %v226_v3 }
  0xcf   :  { %v242_v10 = vadd.f32 %v241_v9, %v227_v8  ;;  %v205_v11 = vadd.f32 %v204_v7, %v586_v6 }
  0xd1   :  { %v206_v13 = vrot.slane %v205_v11, 4  ;;  %v243_v14 = vadd.f32 %v242_v10, %v228_v12 }
  0xd3   :  { %v207_v15 = vadd.f32 %v206_v13, %v205_v11  ;;  %v244_v24 = vrot.slane %v243_v14, 4 }
  0xd5   :  { %v208_v26 = vrot.slane %v207_v15, 2  ;;  %v245_v27 = vadd.f32 %v244_v24, %v243_v14 }
  0xd7   :  { %v209_v28 = vadd.f32 %v208_v26, %v207_v15  ;;  %v246_v29 = vrot.slane %v245_v27, 2 }
  0xd9   :  { %v210_v30 = vrot.slane %v209_v28, 1  ;;  %v247_v32 = vadd.f32 %v246_v29, %v245_v27 }
  0xdb   :  { %v211_v33 = vadd.f32 %v210_v30, %v209_v28  ;;  %v248_v34 = vrot.slane %v247_v32, 1 }
  0xdd   :  { %v212_v36 = vmul.f32 0.0078125, %v211_v33  ;;  %v249_v37 = vadd.f32 %v248_v34, %v247_v32 }
  0xdf   :  { %v250_v38 = vmul.f32 0.0078125, %v249_v37  ;;  %v251_v40 = vmul.f32 %v212_v36, %v212_v36 }
  0xe1   :  { %v252_v41 = vsub.f32 %v250_v38, %v251_v40 }
  0xe3   :  { %v253_v42 = vmax.f32 %v252_v41, 0.0 }
  0xe5   :  { %v255_v44 = vadd.f32 1e-05, %v253_v42 }
  0xe7   :  { %444 = vrsqrt.f32 %v255_v44  ;;  %vm262_vm1 = vweird.f32 %v255_v44 }
  0xed   :  { %v445_v45 = vpop.eup %444 }
  0xee   :  { %v257_v46 = vmul.f32 %v445_v45, %v255_v44  ;;  %vm263_vm0 = vweird.f32 %v445_v45 }
  0xef   :  { %vm264_vm2 = vmor %vm262_vm1, %vm263_vm0 }
  0xf0   :  { %v258_v47 = vmul.f32 %v445_v45, %v257_v46 }
  0xf2   :  { %v259_v48 = vmul.f32 0.5, %v258_v47 }
  0xf4   :  { %v260_v49 = vsub.f32 1.5, %v259_v48 }
  0xf6   :  { %v261_v51 = vmul.f32 %v445_v45, %v260_v49 }
  0xf8   :  { %v265_v52 = vsel %vm264_vm2, %v445_v45, %v261_v51 }
  0xf9   :  { %v266_v54 = vmul.f32 %v265_v52, %v254_v50 }
  0xfb   :  { %v268_v56 = vmul.f32 %v266_v54, %v212_v36  ;;  %v270_v59 = vperm.slane %v266_v54, 0 }
  0xfd   :  { %v269_v58 = vsub.f32 %v267_v55, %v268_v56  ;;  %v271_v60 = vmul.f32 %v270_v59, %v514_v16  ;;  %v272_v61 = vmul.f32 %v270_v59, %v518_v18  ;;  %v273_v62 = vmul.f32 %v270_v59, %v524_v21 }
  0xfe   :  { %v274_v0 = vmul.f32 %v270_v59, %v541_v31  ;;  %v275_v1 = vmul.f32 %v270_v59, %v516_v17  ;;  %v276_v5 = vmul.f32 %v270_v59, %v522_v20  ;;  %v277_v8 = vmul.f32 %v270_v59, %v532_v25 }
  0xff   :  { %v287_v63 = vperm.slane %v269_v58, 0  ;;  %v278_v16 = vmul.f32 %v270_v59, %v556_v43  ;;  %v279_v18 = vmul.f32 %v270_v59, %v520_v19  ;;  %v280_v17 = vmul.f32 %v270_v59, %v528_v23 }
 0x100   :  { %v281_v15 = vmul.f32 %v270_v59, %v551_v39  ;;  %v282_v25 = vmul.f32 %v270_v59, %v572_v57  ;;  %v283_v23 = vmul.f32 %v270_v59, %v526_v22  ;;  %v284_v39 = vmul.f32 %v270_v59, %v546_v35 }
 0x101   :  { %v288_v2 = vadd.f32 %v287_v63, %v271_v60  ;;  %v289_v3 = vadd.f32 %v287_v63, %v272_v61  ;;  %v290_v4 = vadd.f32 %v287_v63, %v273_v62  ;;  %v291_v7 = vadd.f32 %v287_v63, %v274_v0 }
 0x102   :  { %v292_v9 = vadd.f32 %v287_v63, %v275_v1  ;;  %v293_v10 = vadd.f32 %v287_v63, %v276_v5  ;;  %v294_v21 = vadd.f32 %v287_v63, %v277_v8  ;;  %v295_v13 = vadd.f32 %v287_v63, %v278_v16 }
 0x103   :  { %v304_v11 = vmax.f32 %v288_v2, 0.0  ;;  %v305_v12 = vmax.f32 %v289_v3, 0.0  ;;  %v306_v31 = vmax.f32 %v290_v4, 0.0  ;;  %v307_v14 = vmax.f32 %v291_v7, 0.0 }
 0x104   :  { %v296_v20 = vadd.f32 %v287_v63, %v279_v18  ;;  %v308_v24 = vmax.f32 %v292_v9, 0.0  ;;  %v297_v19 = vadd.f32 %v287_v63, %v280_v17  ;;  %v309_v43 = vmax.f32 %v293_v10, 0.0 }
 0x105   :  { %320 = vst [vmem:[%s667_s3] sm:$0xff] %v304_v11  ;;  %v298_v26 = vadd.f32 %v287_v63, %v281_v15  ;;  %v310_v27 = vmax.f32 %v294_v21, 0.0  ;;  %v299_v28 = vadd.f32 %v287_v63, %v282_v25  ;;  %v311_v29 = vmax.f32 %v295_v13, 0.0 }
 0x106   :  { %321 = vst [vmem:[%s667_s3 + $0x8] sm:$0xff] %v305_v12  ;;  %v285_v57 = vmul.f32 %v270_v59, %v567_v53  ;;  %v300_v30 = vadd.f32 %v287_v63, %v283_v23  ;;  %v312_v32 = vmax.f32 %v296_v20, 0.0  ;;  %v286_v22 = vmul.f32 %v270_v59, %v586_v6 }
 0x107   :  { %322 = vst [vmem:[%s667_s3 + $0x10] sm:$0xff] %v306_v31  ;;  %v301_v33 = vadd.f32 %v287_v63, %v284_v39  ;;  %v313_v34 = vmax.f32 %v297_v19, 0.0  ;;  %v314_v36 = vmax.f32 %v298_v26, 0.0  ;;  %v315_v37 = vmax.f32 %v299_v28, 0.0 }
 0x108   :  { %323 = vst [vmem:[%s667_s3 + $0x18] sm:$0xff] %v307_v14  ;;  %v302_v35 = vadd.f32 %v287_v63, %v285_v57  ;;  %v303_v53 = vadd.f32 %v287_v63, %v286_v22  ;;  %v316_v38 = vmax.f32 %v300_v30, 0.0 }
 0x109   :  { %324 = vst [vmem:[%s667_s3 + $0x20] sm:$0xff] %v308_v24  ;;  %v317_v6 = vmax.f32 %v301_v33, 0.0 }
 0x10a   :  { %325 = vst [vmem:[%s667_s3 + $0x28] sm:$0xff] %v309_v43  ;;  %v318_v40 = vmax.f32 %v302_v35, 0.0  ;;  %v319_v41 = vmax.f32 %v303_v53, 0.0 }
 0x10b   :  { %326 = vst [vmem:[%s667_s3 + $0x30] sm:$0xff] %v310_v27 }
 0x10c   :  { %327 = vst [vmem:[%s667_s3 + $0x38] sm:$0xff] %v311_v29 }
 0x10d   :  { %328 = vst [vmem:[%s667_s3 + $0x40] sm:$0xff] %v312_v32 }
 0x10e   :  { %329 = vst [vmem:[%s667_s3 + $0x48] sm:$0xff] %v313_v34 }
 0x10f   :  { %330 = vst [vmem:[%s667_s3 + $0x50] sm:$0xff] %v314_v36 }
 0x110   :  { %331 = vst [vmem:[%s667_s3 + $0x58] sm:$0xff] %v315_v37 }
 0x111   :  { %332 = vst [vmem:[%s667_s3 + $0x60] sm:$0xff] %v316_v38 }
 0x112   :  { %333 = vst [vmem:[%s667_s3 + $0x68] sm:$0xff] %v317_v6 }
 0x113   :  { %334 = vst [vmem:[%s667_s3 + $0x70] sm:$0xff] %v318_v40 }
 0x114   :  { %335 = vst [vmem:[%s667_s3 + $0x78] sm:$0xff] %v319_v41 }

</bundles_post_ra>
